<compile_context>
chip_gen: v7x
topology: tpu7x:2x2x1
jax: 0.10.0
libtpu: 0.0.40
codegen_flags: <defaults>
</compile_context>

<pallas_src>
import jax
import jax.numpy as jnp
from jax.experimental import pallas as pl
from jax.experimental.pallas import tpu as pltpu


def _round_up(a, b):
    return (a + b - 1) // b * b


def _pick_tile(pix, n_images, target):
    """Largest lane-dense pixel tile <= target; keep >= 2 grid steps (v7x)."""
    if pix <= 128:
        return pix                      # full-dim block (exempt from the 128 rule)
    tile = min(_round_up(target, 128), _round_up(pix, 128))
    if n_images * pl.cdiv(pix, tile) < 2:
        tile = _round_up(pl.cdiv(pix, 2), 128)
    return tile


def _ordinal_kernel(x_ref, w1_ref, w2_ref, b2_ref, o_ref, xext_ref):
    """One (image, pixel-tile) grid point, all K heads fused.

    x_ref   : (1, C_in, TM)          input pixel tile, channels-major
    w1_ref  : (K, C_mid, C_in+1)     layer-1 weights, bias folded as last column
    w2_ref  : (K, K*C_out, C_mid)    layer-2 weights, head k embedded at rows k*C_out
    b2_ref  : (K*C_out, 1)           layer-2 bias (f32)
    o_ref   : (1, K*C_out, TM)       concatenated sigmoid probabilities (f32)
    xext_ref: (C_in+1, TM) scratch   [x ; 1] in the MXU compute dtype
    """
    c_in = x_ref.shape[1]
    num_heads = w1_ref.shape[0]

    # Bias-augmented input [x ; 1] built once per tile (C_in+1 rows -> trivial):
    # the layer-1 bias add happens inside the MXU instead of as a vadd on the slab.
    xext_ref[...] = jnp.ones(xext_ref.shape, xext_ref.dtype)
    xext_ref[0:c_in, :] = x_ref[0].astype(xext_ref.dtype)
    x_ext = xext_ref[...]                                          # (C_in+1, TM)

    logits = None                                                  # (K*C_out, TM) f32
    for k in range(num_heads):          # K is small & static; hidden stays (C_mid, TM)
        h = jnp.dot(w1_ref[k], x_ext, preferred_element_type=jnp.float32)
        h = jnp.maximum(h, 0.0)         # the only elementwise op on the hidden slab
        zk = jnp.dot(w2_ref[k], h, preferred_element_type=jnp.float32)
        logits = zk if logits is None else logits + zk

    logits = logits + b2_ref[...]
    # sigmoid(z) = 1 / (1 + exp(-z)); exp + approximate reciprocal run on the EUP.
    o_ref[0] = pl.reciprocal(1.0 + jnp.exp(-logits), approx=True).astype(o_ref.dtype)


def ordinal_regression_forward(x, w1, b1, w2, b2, *,
                               tile_m=16384, compute_dtype=jnp.bfloat16):
    """Forward pass of OrdinalRegressionNetwork (K independent 1x1-conv heads).

    x : (N, C_in, H, W);  w1: (K, C_in, C_mid);  b1: (K, C_mid)
    w2: (K, C_mid, C_out);  b2: (K, C_out)
    Returns (N, K*C_out, H, W) float32, matching torch.cat(probabilities, dim=1).
    """
    N, C_in, H, W = x.shape
    K, _, C_mid = w1.shape
    C_out = w2.shape[-1]
    PIX = H * W

    # ---- pack weights once; they stay VMEM-resident (constant index maps) ----
    # Layer 1: (K, C_mid, C_in+1), bias folded as the last column (MXU adds b1).
    w1_packed = jnp.concatenate(
        [jnp.transpose(w1, (0, 2, 1)), b1[:, :, None]], axis=-1
    ).astype(compute_dtype)
    # Layer 2: head k's (C_out, C_mid) rows embedded at row offset k*C_out of a
    # (K*C_out, C_mid) slab -> each head's matmul emits a dense K*C_out-row result
    # that accumulates straight into the output logits (zero rows cost nothing:
    # MXU has huge slack; avoids 1-row masked stores / sublane concats).
    w2_t = jnp.transpose(w2, (0, 2, 1)).astype(jnp.float32)         # (K, C_out, C_mid)
    w2_embed = jnp.zeros((K, K * C_out, C_mid), jnp.float32)
    for k in range(K):
        w2_embed = w2_embed.at[k, k * C_out:(k + 1) * C_out, :].set(w2_t[k])
    b2_packed = b2.reshape(K * C_out, 1).astype(jnp.float32)

    # ---- layout: channels-major, pixels on the lane axis; no pad, no slice ----
    fold = (N > 1) and (PIX < tile_m)
    if fold:
        # Small images: merge batch into the pixel axis (single cheap transpose,
        # fused with the compute-dtype cast) so tiles stay wide.
        x_flat = jnp.transpose(
            x.reshape(N, C_in, PIX).astype(compute_dtype), (1, 0, 2)
        ).reshape(1, C_in, N * PIX)
        n_img, pix = 1, N * PIX
    else:
        x_flat = x.reshape(N, C_in, PIX)   # free reshape; dtype cast happens in-kernel
        n_img, pix = N, PIX

    tile = _pick_tile(pix, n_img, tile_m)
    grid = (n_img, pl.cdiv(pix, tile))

    out_flat = pl.pallas_call(
        _ordinal_kernel,
        out_shape=jax.ShapeDtypeStruct((n_img, K * C_out, pix), jnp.float32),
        grid_spec=pltpu.PrefetchScalarGridSpec(
            num_scalar_prefetch=0,
            grid=grid,
            in_specs=[
                pl.BlockSpec((1, C_in, tile), lambda n, j: (n, 0, j)),        # x tile
                pl.BlockSpec((K, C_mid, C_in + 1), lambda n, j: (0, 0, 0)),   # W1 (+bias col)
                pl.BlockSpec((K, K * C_out, C_mid), lambda n, j: (0, 0, 0)),  # W2 embedded
                pl.BlockSpec((K * C_out, 1), lambda n, j: (0, 0)),            # b2
            ],
            out_specs=pl.BlockSpec((1, K * C_out, tile), lambda n, j: (n, 0, j)),
            scratch_shapes=[pltpu.VMEM((C_in + 1, tile), compute_dtype)],     # [x ; 1]
        ),
        compiler_params=pltpu.CompilerParams(
            dimension_semantics=("parallel", "parallel"),
            # Explicit scoped-VMEM budget: ~10-20 MB working set at tile=16384,
            # safe on v5e/v6e (128 MiB) and v7x (64 MiB physical).
            vmem_limit_bytes=48 * 1024 * 1024,
        ),
    )(x_flat, w1_packed, w2_embed, b2_packed)

    if fold:
        out = jnp.transpose(out_flat.reshape(K * C_out, N, PIX), (1, 0, 2))
    else:
        out = out_flat
    return out.reshape(N, K * C_out, H, W)


def _reference_forward(x_nchw, w1, b1, w2, b2):
    """Pure-JAX reference replicating the PyTorch semantics (1x1 conv heads)."""
    N, C_in, H, W = x_nchw.shape
    K = w1.shape[0]
    x_rows = jnp.transpose(x_nchw, (0, 2, 3, 1)).reshape(-1, C_in)
    outs = []
    for k in range(K):
        h = jnp.maximum(x_rows @ w1[k] + b1[k], 0.0)
        outs.append(jax.nn.sigmoid(h @ w2[k] + b2[k]))
    out = jnp.concatenate(outs, axis=-1).reshape(N, H, W, -1)
    return jnp.transpose(out, (0, 3, 1, 2))


if __name__ == "__main__":
    # Small deterministic config consistent with the module's __init__.
    in_channels = 4
    mid_channels = 32
    out_channels = 1
    num_of_classes = 8
    N, H, W = 2, 16, 16

    key = jax.random.PRNGKey(0)
    kx, kw1, kb1, kw2, kb2 = jax.random.split(key, 5)

    x = jax.random.normal(kx, (N, in_channels, H, W), dtype=jnp.float32)
    # Per-head weights stacked on a leading K axis (matches the ModuleList).
    w1 = jax.random.normal(kw1, (num_of_classes, in_channels, mid_channels),
                           dtype=jnp.float32) * 0.1
    b1 = jax.random.normal(kb1, (num_of_classes, mid_channels), dtype=jnp.float32) * 0.1
    w2 = jax.random.normal(kw2, (num_of_classes, mid_channels, out_channels),
                           dtype=jnp.float32) * 0.1
    b2 = jax.random.normal(kb2, (num_of_classes, out_channels), dtype=jnp.float32) * 0.1

    out = ordinal_regression_forward(x, w1, b1, w2, b2)
    out = jax.block_until_ready(out)

    ref = _reference_forward(x, w1, b1, w2, b2)
    assert out.shape == (N, num_of_classes * out_channels, H, W), out.shape
    # bf16 MXU inputs + EUP approx-reciprocal sigmoid -> loosened tolerance.
    max_err = float(jnp.max(jnp.abs(out - ref)))
    assert jnp.allclose(out, ref, atol=2e-2, rtol=2e-2), f"mismatch vs reference (max {max_err})"

    print("KERNEL_OK")
</pallas_src>

<mosaic_0001>
module attributes {stable_mosaic.version = 11 : i64} {
  func.func @_ordinal_kernel(%arg0: i32, %arg1: i32, %arg2: memref<1x4x256xbf16, #tpu.memory_space<vmem>>, %arg3: memref<8x32x5xbf16, #tpu.memory_space<vmem>>, %arg4: memref<8x8x32xf32, #tpu.memory_space<vmem>>, %arg5: memref<8x1xf32, #tpu.memory_space<vmem>>, %arg6: memref<1x8x256xf32, #tpu.memory_space<vmem>>, %arg7: memref<5x256xbf16, #tpu.memory_space<vmem>>) attributes {dimension_semantics = [#tpu.dimension_semantics<parallel>, #tpu.dimension_semantics<parallel>], iteration_bounds = array<i64: 1, 2>, scalar_prefetch = 0 : i64, scratch_operands = 1 : i64, tpu.core_type = #tpu.core_type<tc>, window_params = [{transform_indices = @transform_0, window_bounds = array<i64: 1, 4, 256>}, {pipeline_mode = #tpu.pipeline_mode<synchronous>, transform_indices = @transform_1, window_bounds = array<i64: 8, 32, 5>}, {pipeline_mode = #tpu.pipeline_mode<synchronous>, transform_indices = @transform_2, window_bounds = array<i64: 8, 8, 32>}, {pipeline_mode = #tpu.pipeline_mode<synchronous>, transform_indices = @transform_3, window_bounds = array<i64: 8, 1>}, {transform_indices = @transform_4, window_bounds = array<i64: 1, 8, 256>}]} {
    %cst = arith.constant 1.000000e+00 : bf16
    %0 = vector.broadcast %cst : bf16 to vector<5x256xbf16>
    %c0 = arith.constant 0 : index
    %c0_0 = arith.constant 0 : index
    %1 = vector.load %arg7[%c0, %c0_0] : memref<5x256xbf16, #tpu.memory_space<vmem>>, vector<5x256xbf16>
    tpu.vector_store %arg7[%c0, %c0_0], %0 {strides = array<i32>} : memref<5x256xbf16, #tpu.memory_space<vmem>>, vector<5x256xbf16>,
    %c0_1 = arith.constant 0 : index
    %c0_2 = arith.constant 0 : index
    %c0_3 = arith.constant 0 : index
    %2 = vector.load %arg2[%c0_1, %c0_2, %c0_3] : memref<1x4x256xbf16, #tpu.memory_space<vmem>>, vector<1x4x256xbf16>
    %3 = vector.shape_cast %2 : vector<1x4x256xbf16> to vector<4x256xbf16>
    %c0_4 = arith.constant 0 : index
    %c0_5 = arith.constant 0 : index
    %4 = vector.load %arg7[%c0_4, %c0_5] : memref<5x256xbf16, #tpu.memory_space<vmem>>, vector<4x256xbf16>
    tpu.vector_store %arg7[%c0_4, %c0_5], %3 {strides = array<i32>} : memref<5x256xbf16, #tpu.memory_space<vmem>>, vector<4x256xbf16>,
    %c0_6 = arith.constant 0 : index
    %c0_7 = arith.constant 0 : index
    %5 = vector.load %arg7[%c0_6, %c0_7] : memref<5x256xbf16, #tpu.memory_space<vmem>>, vector<5x256xbf16>
    %c0_8 = arith.constant 0 : index
    %c0_9 = arith.constant 0 : index
    %c0_10 = arith.constant 0 : index
    %6 = vector.load %arg3[%c0_8, %c0_9, %c0_10] : memref<8x32x5xbf16, #tpu.memory_space<vmem>>, vector<1x32x5xbf16>
    %7 = vector.shape_cast %6 : vector<1x32x5xbf16> to vector<32x5xbf16>
    %cst_11 = arith.constant dense<0.000000e+00> : vector<32x256xf32>
    %8 = tpu.matmul %7, %5, %cst_11 {dimension_numbers = #tpu.dot_dimension_numbers<[1], [0], [0], [1], [0, 0, 1, 1], [], []>} : vector<32x5xbf16>, vector<5x256xbf16>, vector<32x256xf32> -> vector<32x256xf32>
    %cst_12 = arith.constant 0.000000e+00 : f32
    %9 = vector.broadcast %cst_12 : f32 to vector<32x256xf32>
    %10 = arith.maximumf %8, %9 : vector<32x256xf32>
    %c0_13 = arith.constant 0 : index
    %c0_14 = arith.constant 0 : index
    %c0_15 = arith.constant 0 : index
    %11 = vector.load %arg4[%c0_13, %c0_14, %c0_15] : memref<8x8x32xf32, #tpu.memory_space<vmem>>, vector<1x8x32xf32>
    %12 = vector.shape_cast %11 : vector<1x8x32xf32> to vector<8x32xf32>
    %cst_16 = arith.constant dense<0.000000e+00> : vector<8x256xf32>
    %13 = tpu.matmul %12, %10, %cst_16 {dimension_numbers = #tpu.dot_dimension_numbers<[1], [0], [0], [1], [0, 0, 1, 1], [], []>} : vector<8x32xf32>, vector<32x256xf32>, vector<8x256xf32> -> vector<8x256xf32>
    %c1 = arith.constant 1 : index
    %c0_17 = arith.constant 0 : index
    %c0_18 = arith.constant 0 : index
    %14 = vector.load %arg3[%c1, %c0_17, %c0_18] : memref<8x32x5xbf16, #tpu.memory_space<vmem>>, vector<1x32x5xbf16>
    %15 = vector.shape_cast %14 : vector<1x32x5xbf16> to vector<32x5xbf16>
    %cst_19 = arith.constant dense<0.000000e+00> : vector<32x256xf32>
    %16 = tpu.matmul %15, %5, %cst_19 {dimension_numbers = #tpu.dot_dimension_numbers<[1], [0], [0], [1], [0, 0, 1, 1], [], []>} : vector<32x5xbf16>, vector<5x256xbf16>, vector<32x256xf32> -> vector<32x256xf32>
    %cst_20 = arith.constant 0.000000e+00 : f32
    %17 = vector.broadcast %cst_20 : f32 to vector<32x256xf32>
    %18 = arith.maximumf %16, %17 : vector<32x256xf32>
    %c1_21 = arith.constant 1 : index
    %c0_22 = arith.constant 0 : index
    %c0_23 = arith.constant 0 : index
    %19 = vector.load %arg4[%c1_21, %c0_22, %c0_23] : memref<8x8x32xf32, #tpu.memory_space<vmem>>, vector<1x8x32xf32>
    %20 = vector.shape_cast %19 : vector<1x8x32xf32> to vector<8x32xf32>
    %cst_24 = arith.constant dense<0.000000e+00> : vector<8x256xf32>
    %21 = tpu.matmul %20, %18, %cst_24 {dimension_numbers = #tpu.dot_dimension_numbers<[1], [0], [0], [1], [0, 0, 1, 1], [], []>} : vector<8x32xf32>, vector<32x256xf32>, vector<8x256xf32> -> vector<8x256xf32>
    %22 = arith.addf %13, %21 : vector<8x256xf32>
    %c2 = arith.constant 2 : index
    %c0_25 = arith.constant 0 : index
    %c0_26 = arith.constant 0 : index
    %23 = vector.load %arg3[%c2, %c0_25, %c0_26] : memref<8x32x5xbf16, #tpu.memory_space<vmem>>, vector<1x32x5xbf16>
    %24 = vector.shape_cast %23 : vector<1x32x5xbf16> to vector<32x5xbf16>
    %cst_27 = arith.constant dense<0.000000e+00> : vector<32x256xf32>
    %25 = tpu.matmul %24, %5, %cst_27 {dimension_numbers = #tpu.dot_dimension_numbers<[1], [0], [0], [1], [0, 0, 1, 1], [], []>} : vector<32x5xbf16>, vector<5x256xbf16>, vector<32x256xf32> -> vector<32x256xf32>
    %cst_28 = arith.constant 0.000000e+00 : f32
    %26 = vector.broadcast %cst_28 : f32 to vector<32x256xf32>
    %27 = arith.maximumf %25, %26 : vector<32x256xf32>
    %c2_29 = arith.constant 2 : index
    %c0_30 = arith.constant 0 : index
    %c0_31 = arith.constant 0 : index
    %28 = vector.load %arg4[%c2_29, %c0_30, %c0_31] : memref<8x8x32xf32, #tpu.memory_space<vmem>>, vector<1x8x32xf32>
    %29 = vector.shape_cast %28 : vector<1x8x32xf32> to vector<8x32xf32>
    %cst_32 = arith.constant dense<0.000000e+00> : vector<8x256xf32>
    %30 = tpu.matmul %29, %27, %cst_32 {dimension_numbers = #tpu.dot_dimension_numbers<[1], [0], [0], [1], [0, 0, 1, 1], [], []>} : vector<8x32xf32>, vector<32x256xf32>, vector<8x256xf32> -> vector<8x256xf32>
    %31 = arith.addf %22, %30 : vector<8x256xf32>
    %c3 = arith.constant 3 : index
    %c0_33 = arith.constant 0 : index
    %c0_34 = arith.constant 0 : index
    %32 = vector.load %arg3[%c3, %c0_33, %c0_34] : memref<8x32x5xbf16, #tpu.memory_space<vmem>>, vector<1x32x5xbf16>
    %33 = vector.shape_cast %32 : vector<1x32x5xbf16> to vector<32x5xbf16>
    %cst_35 = arith.constant dense<0.000000e+00> : vector<32x256xf32>
    %34 = tpu.matmul %33, %5, %cst_35 {dimension_numbers = #tpu.dot_dimension_numbers<[1], [0], [0], [1], [0, 0, 1, 1], [], []>} : vector<32x5xbf16>, vector<5x256xbf16>, vector<32x256xf32> -> vector<32x256xf32>
    %cst_36 = arith.constant 0.000000e+00 : f32
    %35 = vector.broadcast %cst_36 : f32 to vector<32x256xf32>
    %36 = arith.maximumf %34, %35 : vector<32x256xf32>
    %c3_37 = arith.constant 3 : index
    %c0_38 = arith.constant 0 : index
    %c0_39 = arith.constant 0 : index
    %37 = vector.load %arg4[%c3_37, %c0_38, %c0_39] : memref<8x8x32xf32, #tpu.memory_space<vmem>>, vector<1x8x32xf32>
    %38 = vector.shape_cast %37 : vector<1x8x32xf32> to vector<8x32xf32>
    %cst_40 = arith.constant dense<0.000000e+00> : vector<8x256xf32>
    %39 = tpu.matmul %38, %36, %cst_40 {dimension_numbers = #tpu.dot_dimension_numbers<[1], [0], [0], [1], [0, 0, 1, 1], [], []>} : vector<8x32xf32>, vector<32x256xf32>, vector<8x256xf32> -> vector<8x256xf32>
    %40 = arith.addf %31, %39 : vector<8x256xf32>
    %c4 = arith.constant 4 : index
    %c0_41 = arith.constant 0 : index
    %c0_42 = arith.constant 0 : index
    %41 = vector.load %arg3[%c4, %c0_41, %c0_42] : memref<8x32x5xbf16, #tpu.memory_space<vmem>>, vector<1x32x5xbf16>
    %42 = vector.shape_cast %41 : vector<1x32x5xbf16> to vector<32x5xbf16>
    %cst_43 = arith.constant dense<0.000000e+00> : vector<32x256xf32>
    %43 = tpu.matmul %42, %5, %cst_43 {dimension_numbers = #tpu.dot_dimension_numbers<[1], [0], [0], [1], [0, 0, 1, 1], [], []>} : vector<32x5xbf16>, vector<5x256xbf16>, vector<32x256xf32> -> vector<32x256xf32>
    %cst_44 = arith.constant 0.000000e+00 : f32
    %44 = vector.broadcast %cst_44 : f32 to vector<32x256xf32>
    %45 = arith.maximumf %43, %44 : vector<32x256xf32>
    %c4_45 = arith.constant 4 : index
    %c0_46 = arith.constant 0 : index
    %c0_47 = arith.constant 0 : index
    %46 = vector.load %arg4[%c4_45, %c0_46, %c0_47] : memref<8x8x32xf32, #tpu.memory_space<vmem>>, vector<1x8x32xf32>
    %47 = vector.shape_cast %46 : vector<1x8x32xf32> to vector<8x32xf32>
    %cst_48 = arith.constant dense<0.000000e+00> : vector<8x256xf32>
    %48 = tpu.matmul %47, %45, %cst_48 {dimension_numbers = #tpu.dot_dimension_numbers<[1], [0], [0], [1], [0, 0, 1, 1], [], []>} : vector<8x32xf32>, vector<32x256xf32>, vector<8x256xf32> -> vector<8x256xf32>
    %49 = arith.addf %40, %48 : vector<8x256xf32>
    %c5 = arith.constant 5 : index
    %c0_49 = arith.constant 0 : index
    %c0_50 = arith.constant 0 : index
    %50 = vector.load %arg3[%c5, %c0_49, %c0_50] : memref<8x32x5xbf16, #tpu.memory_space<vmem>>, vector<1x32x5xbf16>
    %51 = vector.shape_cast %50 : vector<1x32x5xbf16> to vector<32x5xbf16>
    %cst_51 = arith.constant dense<0.000000e+00> : vector<32x256xf32>
    %52 = tpu.matmul %51, %5, %cst_51 {dimension_numbers = #tpu.dot_dimension_numbers<[1], [0], [0], [1], [0, 0, 1, 1], [], []>} : vector<32x5xbf16>, vector<5x256xbf16>, vector<32x256xf32> -> vector<32x256xf32>
    %cst_52 = arith.constant 0.000000e+00 : f32
    %53 = vector.broadcast %cst_52 : f32 to vector<32x256xf32>
    %54 = arith.maximumf %52, %53 : vector<32x256xf32>
    %c5_53 = arith.constant 5 : index
    %c0_54 = arith.constant 0 : index
    %c0_55 = arith.constant 0 : index
    %55 = vector.load %arg4[%c5_53, %c0_54, %c0_55] : memref<8x8x32xf32, #tpu.memory_space<vmem>>, vector<1x8x32xf32>
    %56 = vector.shape_cast %55 : vector<1x8x32xf32> to vector<8x32xf32>
    %cst_56 = arith.constant dense<0.000000e+00> : vector<8x256xf32>
    %57 = tpu.matmul %56, %54, %cst_56 {dimension_numbers = #tpu.dot_dimension_numbers<[1], [0], [0], [1], [0, 0, 1, 1], [], []>} : vector<8x32xf32>, vector<32x256xf32>, vector<8x256xf32> -> vector<8x256xf32>
    %58 = arith.addf %49, %57 : vector<8x256xf32>
    %c6 = arith.constant 6 : index
    %c0_57 = arith.constant 0 : index
    %c0_58 = arith.constant 0 : index
    %59 = vector.load %arg3[%c6, %c0_57, %c0_58] : memref<8x32x5xbf16, #tpu.memory_space<vmem>>, vector<1x32x5xbf16>
    %60 = vector.shape_cast %59 : vector<1x32x5xbf16> to vector<32x5xbf16>
    %cst_59 = arith.constant dense<0.000000e+00> : vector<32x256xf32>
    %61 = tpu.matmul %60, %5, %cst_59 {dimension_numbers = #tpu.dot_dimension_numbers<[1], [0], [0], [1], [0, 0, 1, 1], [], []>} : vector<32x5xbf16>, vector<5x256xbf16>, vector<32x256xf32> -> vector<32x256xf32>
    %cst_60 = arith.constant 0.000000e+00 : f32
    %62 = vector.broadcast %cst_60 : f32 to vector<32x256xf32>
    %63 = arith.maximumf %61, %62 : vector<32x256xf32>
    %c6_61 = arith.constant 6 : index
    %c0_62 = arith.constant 0 : index
    %c0_63 = arith.constant 0 : index
    %64 = vector.load %arg4[%c6_61, %c0_62, %c0_63] : memref<8x8x32xf32, #tpu.memory_space<vmem>>, vector<1x8x32xf32>
    %65 = vector.shape_cast %64 : vector<1x8x32xf32> to vector<8x32xf32>
    %cst_64 = arith.constant dense<0.000000e+00> : vector<8x256xf32>
    %66 = tpu.matmul %65, %63, %cst_64 {dimension_numbers = #tpu.dot_dimension_numbers<[1], [0], [0], [1], [0, 0, 1, 1], [], []>} : vector<8x32xf32>, vector<32x256xf32>, vector<8x256xf32> -> vector<8x256xf32>
    %67 = arith.addf %58, %66 : vector<8x256xf32>
    %c7 = arith.constant 7 : index
    %c0_65 = arith.constant 0 : index
    %c0_66 = arith.constant 0 : index
    %68 = vector.load %arg3[%c7, %c0_65, %c0_66] : memref<8x32x5xbf16, #tpu.memory_space<vmem>>, vector<1x32x5xbf16>
    %69 = vector.shape_cast %68 : vector<1x32x5xbf16> to vector<32x5xbf16>
    %cst_67 = arith.constant dense<0.000000e+00> : vector<32x256xf32>
    %70 = tpu.matmul %69, %5, %cst_67 {dimension_numbers = #tpu.dot_dimension_numbers<[1], [0], [0], [1], [0, 0, 1, 1], [], []>} : vector<32x5xbf16>, vector<5x256xbf16>, vector<32x256xf32> -> vector<32x256xf32>
    %cst_68 = arith.constant 0.000000e+00 : f32
    %71 = vector.broadcast %cst_68 : f32 to vector<32x256xf32>
    %72 = arith.maximumf %70, %71 : vector<32x256xf32>
    %c7_69 = arith.constant 7 : index
    %c0_70 = arith.constant 0 : index
    %c0_71 = arith.constant 0 : index
    %73 = vector.load %arg4[%c7_69, %c0_70, %c0_71] : memref<8x8x32xf32, #tpu.memory_space<vmem>>, vector<1x8x32xf32>
    %74 = vector.shape_cast %73 : vector<1x8x32xf32> to vector<8x32xf32>
    %cst_72 = arith.constant dense<0.000000e+00> : vector<8x256xf32>
    %75 = tpu.matmul %74, %72, %cst_72 {dimension_numbers = #tpu.dot_dimension_numbers<[1], [0], [0], [1], [0, 0, 1, 1], [], []>} : vector<8x32xf32>, vector<32x256xf32>, vector<8x256xf32> -> vector<8x256xf32>
    %76 = arith.addf %67, %75 : vector<8x256xf32>
    %c0_73 = arith.constant 0 : index
    %c0_74 = arith.constant 0 : index
    %77 = vector.load %arg5[%c0_73, %c0_74] : memref<8x1xf32, #tpu.memory_space<vmem>>, vector<8x1xf32>
    %78 = vector.broadcast %77 : vector<8x1xf32> to vector<8x256xf32>
    %79 = arith.addf %76, %78 : vector<8x256xf32>
    %cst_75 = arith.constant 0.000000e+00 : f32
    %80 = vector.broadcast %cst_75 : f32 to vector<8x256xf32>
    %81 = arith.subf %80, %79 : vector<8x256xf32>
    %82 = math.exp %81 : vector<8x256xf32>
    %cst_76 = arith.constant 1.000000e+00 : f32
    %83 = vector.broadcast %cst_76 : f32 to vector<8x256xf32>
    %84 = arith.addf %83, %82 : vector<8x256xf32>
    %85 = tpu.reciprocal %84 {approx = true} : vector<8x256xf32> -> vector<8x256xf32>
    %c0_77 = arith.constant 0 : index
    %c0_78 = arith.constant 0 : index
    %c0_79 = arith.constant 0 : index
    %86 = vector.load %arg6[%c0_77, %c0_78, %c0_79] : memref<1x8x256xf32, #tpu.memory_space<vmem>>, vector<1x8x256xf32>
    %87 = vector.shape_cast %86 : vector<1x8x256xf32> to vector<8x256xf32>
    %88 = vector.shape_cast %85 : vector<8x256xf32> to vector<1x8x256xf32>
    tpu.vector_store %arg6[%c0_77, %c0_78, %c0_79], %88 {strides = array<i32>} : memref<1x8x256xf32, #tpu.memory_space<vmem>>, vector<1x8x256xf32>,
    return
  }
  func.func @transform_0(%arg0: i32, %arg1: i32) -> (i32, i32, i32) {
    %c0_i32 = arith.constant 0 : i32
    %c0_i32_0 = arith.constant 0 : i32
    return %arg0, %c0_i32, %arg1 : i32, i32, i32
  }
  func.func @transform_1(%arg0: i32, %arg1: i32) -> (i32, i32, i32) {
    %c0_i32 = arith.constant 0 : i32
    %c0_i32_0 = arith.constant 0 : i32
    %c0_i32_1 = arith.constant 0 : i32
    %c0_i32_2 = arith.constant 0 : i32
    return %c0_i32, %c0_i32_0, %c0_i32_1 : i32, i32, i32
  }
  func.func @transform_2(%arg0: i32, %arg1: i32) -> (i32, i32, i32) {
    %c0_i32 = arith.constant 0 : i32
    %c0_i32_0 = arith.constant 0 : i32
    %c0_i32_1 = arith.constant 0 : i32
    %c0_i32_2 = arith.constant 0 : i32
    return %c0_i32, %c0_i32_0, %c0_i32_1 : i32, i32, i32
  }
  func.func @transform_3(%arg0: i32, %arg1: i32) -> (i32, i32) {
    %c0_i32 = arith.constant 0 : i32
    %c0_i32_0 = arith.constant 0 : i32
    %c0_i32_1 = arith.constant 0 : i32
    return %c0_i32, %c0_i32_0 : i32, i32
  }
  func.func @transform_4(%arg0: i32, %arg1: i32) -> (i32, i32, i32) {
    %c0_i32 = arith.constant 0 : i32
    %c0_i32_0 = arith.constant 0 : i32
    return %arg0, %c0_i32, %arg1 : i32, i32, i32
  }
}

</mosaic_0001>

<bundles_post_ra>
// kernel: tpu_custom_call.1
= control target key start
LH: loop header
LB: loop body
LE: loop exit
PB: predicated region body
PF: predicated region fallthrough
CT: control target
= control target key end

     0   :  { %9 = vsyncpa [#allocation4], 0  ;;  %s2280_s0 = inlined_call_operand.vmem [shape: bf16[1,4,512], index: 0, kind: input, shape index: {}]   ;;  %s2281_s1 = inlined_call_operand.vmem [shape: bf16[8,32,5], index: 1, kind: input, shape index: {}]   ;;  %s2282_s2 = inlined_call_operand.vmem [shape: f32[8,8,32], index: 2, kind: input, shape index: {}]   ;;  %s2283_s3 = inlined_call_operand.vmem [shape: f32[8,1], index: 3, kind: input, shape index: {}]   ;;  %s2284_s4 = inlined_call_operand.hbm [shape: f32[1,8,512], index: 4, kind: output, shape index: {}]  }
   0x1   :  { %11 = vsyncpa [#allocation4 + $0x1], 0  ;;  %s2021_s15 = smov 0   ;;  %s2023_s16 = smov 0  }
   0x2   :  { %s2025_s17 = smov 0   ;;  %s2027_s18 = smov 0  }
   0x3   :  { %s2029_s19 = smov 0   ;;  %s2031_s20 = smov 0  }
   0x4 LB: > { %s1655_s21 = sadd.s32 4294967295, %s1990_s20   ;;  %s1656_s22 = sadd.s32 4294967294, %s1990_s20   ;;  %s1990_s20 = sphi %s2031_s20, %s17_s20   ;;  %s1986_s19 = sphi %s2029_s19, %s2291_s19   ;;  %s1982_s18 = sphi %s2027_s18, %s2290_s18   ;;  %s1978_s17 = sphi %s2025_s17, %s2289_s17   ;;  %s1974_s16 = sphi %s2023_s16, %s2288_s16   ;;  %s1970_s15 = sphi %s2021_s15, %s2287_s15  }
   0x5   : > { %s26_s23 = sadd.s32 1, %s1986_s19  ;;  %s129_s24 = sadd.s32 1, %s1978_s17 }
   0x6   : > { %p27_p0 = scmp.ge.s32.totalorder %s26_s23, 2  ;;  %p139_p1 = scmp.ne.s32.totalorder %s1978_s17, %s1974_s16 }
   0x7   : > { %p140_p2 = scmp.eq.s32.totalorder %s1655_s21, 1  ;;  %p145_p3 = scmp.ne.s32.totalorder %s1974_s16, %s1970_s15 }
   0x8   : > { %s2293_s23 = smov (%p27_p0, %s26_s23), 0  ;;  %p146_p5 = scmp.eq.s32.totalorder %s1656_s22, 1 }
   0x9   : > { %p2061_p4 = por %p140_p2, %p139_p1  ;;  %s125_s26 = ssub.s32 %s1986_s19, %s2293_s23 }
   0xa   : > { %p1659_p6 = scmp.ge.s32.totalorder %s1990_s20, 1  ;;  %p127_p7 = scmp.eq.s32.totalorder %s125_s26, 0 }
   0xb   : > { %p2068_p8 = por %p146_p5, %p145_p3  ;;  %p186_p9 = scmp.lt.s32.totalorder %s1990_s20, 3 }
   0xc   : > { %s2074_s28 = scalar_select %p127_p7, %s1978_s17, %s129_s24  }
   0xd   : > { %p187_p10 = pnand %p1659_p6, %p186_p9 }
   0xe   : > { %s1661_s29 = sshll.u32 (!%p187_p10), %s1982_s18, 1  ;;  %vm229_vm0 = vcmask (!%p187_p10), 1042432   ;;  %vm230_vm1 = vsmask.f32 (!%p187_p10), 2304  ;;  %vm232_vm2 = vcmask (!%p187_p10), 1046532   ;;  %v1992_v1 = vmov (!%p187_p10), 0  }
   0xf   : > { %190 = sbr.rel (%p187_p10) target bundleno = 1056 (0x420), region = 36  ;;  %p219_p11 = scmp.lt.s32.totalorder (!%p187_p10), %s1661_s29, 3  ;;  %vm231_vm3 = vmand (!%p187_p10), %vm229_vm0, %vm230_vm1  ;;  %vm233_vm4 = vsmask.f32 (!%p187_p10), 6400  ;;  %v236_v0 = vld [vmem:[#allocation2] sm:$0x77] (!%p187_p10)  ;;  %329 = vmatprep.mubr.bf16.mxu1 (!%p187_p10), %v1992_v1  ;;  %319 = vmatprep.mubr.bf16.mxu0 (!%p187_p10), %v1992_v1 }
  0x10   : > { %vm234_vm5 = vmand (!%p187_p10), %vm232_vm2, %vm233_vm4  ;;  %vm277_vm7 = vcmask (!%p187_p10), 1041408   ;;  %1885 = vset.pattern.permute.xlu0 (!%p187_p10), %v1992_v1  ;;  %v1993_v4 = vmov (!%p187_p10), 65535   ;;  %v1888_v12 = vld [vmem:[%s2281_s1 + $0x8] sm:$0xff] (!%p187_p10)   ;;  %v1891_v13 = vld [vmem:[%s2281_s1] sm:$0xff] (!%p187_p10)   ;;  %vm270_vm8 = vcmask (!%p187_p10), 39936   ;;  %v1994_v20 = vmov (!%p187_p10), 0.0  }
  0x11   : > { %vm235_vm6 = vmor (!%p187_p10), %vm234_vm5, %vm231_vm3  ;;  %v279_v5 = vsel (!%p187_p10), %vm277_vm7, 4294967295, %v1993_v4  ;;  %v1889_v14 = vld [vmem:[%s2281_s1 + $0x10] sm:$0xff] (!%p187_p10)   ;;  %v1890_v15 = vld [vmem:[%s2281_s1 + $0x18] sm:$0xff] (!%p187_p10)   ;;  %vm433_vm9 = vcmask (!%p187_p10), 261120   ;;  %s213_s10 = sand.u32 (!%p187_p10), 1, %s1974_s16   ;;  %s1746_s12 = sshll.u32 (!%p187_p10), %s1982_s18, 8 }
  0x12   : > { %v237_v2 = vsel (!%p187_p10), %vm235_vm6, 1065369472, %v236_v0  ;;  %v280_v6 = vsel (!%p187_p10), %vm229_vm0, %v279_v5, 0  ;;  %v1892_v16 = vld [vmem:[%s2281_s1 + $0x20] sm:$0xff] (!%p187_p10)   ;;  %v1893_v17 = vld [vmem:[%s2281_s1 + $0x28] sm:$0xff] (!%p187_p10)   ;;  %v1894_v18 = vld [vmem:[%s2281_s1 + $0x30] sm:$0xff] (!%p187_p10)   ;;  %s2233_s24 = scalar_lea.hbm (!%p187_p10), %s2284_s4, %s1746_s12 }
  0x13   : > { %238 = vst [vmem:[#allocation2] sm:$0x77] (!%p187_p10), %v237_v2  ;;  %v1895_v19 = vld [vmem:[%s2281_s1 + $0x38] sm:$0xff] (!%p187_p10)   ;;  %v1896_v21 = vld [vmem:[%s2281_s1 + $0x50] sm:$0xff] (!%p187_p10)   ;;  %v1900_v23 = vld [vmem:[%s2281_s1 + $0x60] sm:$0xff] (!%p187_p10)   ;;  %s1660_s11 = sshll.u32 (!%p187_p10), %s213_s10, 4 }
  0x14   : > { %v1898_v22 = vld [vmem:[%s2281_s1 + $0x58] sm:$0xff] (!%p187_p10)   ;;  %v1901_v24 = vld [vmem:[%s2281_s1 + $0x68] sm:$0xff] (!%p187_p10)   ;;  %s215_s13 = scalar_lea.vmem (!%p187_p10), [#allocation3], %s1660_s11  ;;  %s1563_s26 = scalar_lea.sflag (!%p187_p10), [#allocation4], %s213_s10 }
  0x15   : > { %v1678_v4 = vld [vmem:[%s2282_s2 + $0x8] sm:$0xff] (!%p187_p10)  ;;  %s1579_s14 = sshll.u32 (!%p187_p10), %s215_s13, 4  ;;  %s1995_s18 = smov (!%p187_p10), [#allocation3]   ;;  %s2235_s14 = int_to_ptr.vmem [resolvable:$true] %s1579_s14 }
  0x16   : > { %s2295_s29 = smov (!%p219_p11, %s1661_s29), 3 }
  0x17   : > { %s1662_s30 = sshll.u32 %s2295_s29, 1  ;;  %s1912_s29 = scalar_lea.vmem %s2235_s14, 256 }
  0x18   : > { %s224_s7 = scalar_lea.vmem %s2280_s0, %s1662_s30  ;;  %p1913_p12 = scmp.ne.s32.totalorder %s2235_s14, %s1912_s29 }
  0x19   : > { %v1663_v3 = vld.sshfl [vmem:[%s224_s7] sm:$0x33 pattern:$0x76325410]  ;;  %s1916_s30 = sshll.u32 %s1995_s18, 4  ;;  %s1917_s30 = int_to_ptr.vmem [resolvable:$false] %s1916_s30 }
  0x1a   : > { %249 = vst [vmem:[#allocation2] sm:$0x33] %v1663_v3  ;;  %p1914_p13 = pnand %p1913_p12, %p2061_p4  ;;  %s1918_s5 = scalar_lea.vmem %s1917_s30, 512 }
  0x1b   : > { %p1919_p1 = scmp.lt.s32.totalorder %s2235_s14, %s1917_s30  ;;  %p1920_p2 = scmp.lt.s32.totalorder %s1918_s5, %s1912_s29 }
  0x1c   : > { %p1915_p0 = pneg %p1914_p13 }
  0x1d   : > { %p1921_p3 = por %p1920_p2, %p1919_p1 }
  0x1f   : > { %p1922_p5 = pnand %p1921_p3, %p1915_p0 }
  0x21   : > { %v250_v7 = vld [vmem:[#allocation2] sm:$0x77] }
  0x22   : > { %v1667_v8 = vcombine.high %v250_v7, %v250_v7  ;;  %v1666_v9 = vcombine.low %v250_v7, %v250_v7 }
  0x24   : > { %v2085_v10 = vand.u32 %v1667_v8, %v280_v6  ;;  %v2087_v11 = vand.u32 %v1666_v9, %v280_v6 }
  0x26   : > { %1811 = vmatprep.subr.bf16.mxu1 %v2085_v10  ;;  %287 = vmatprep.subr.bf16.mxu0 %v2085_v10 }
  0x27   : > { %1812 = vmatpush1.bf16.msra.mxu1 %v2087_v11  ;;  %288 = vmatpush1.bf16.msra.mxu0 %v2087_v11 }
  0x28   : > { %370 = vmatprep.subr.bf16.mxu1 %v2085_v10 }
  0x2a   : > { %1669 = vmatmul.mubr.msk.bf16.vlgmr.msra.gmra.mrb[0].mxu1 %vm270_vm8, %v1888_v12  ;;  %1668 = vmatmul.mubr.msk.bf16.vlgmr.msra.gmra.mrb[0].mxu0 %vm270_vm8, %v1891_v13 }
  0x2b   : > { %371 = vmatpush1.bf16.msra.mxu1 %v2087_v11  ;;  %402 = vmatprep.mubr.bf16.mxu1 %v1992_v1 }
  0x2c   : > { %603 = vmatprep.subr.bf16.mxu1 %v2085_v10  ;;  %501 = vmatprep.mubr.f32.mxu0 %v1994_v20 }
  0x32   : > { %1676 = vmatmul.mubr.msk.bf16.vlgmr.msra.gmra.mrb[4].mxu1 %vm270_vm8, %v1889_v14 }
  0x33   : > { %604 = vmatpush1.bf16.msra.mxu1 %v2087_v11  ;;  %412 = vmatprep.mubr.bf16.mxu1 %v1992_v1 }
  0x34   : > { %763 = vmatprep.subr.bf16.mxu1 %v2085_v10 }
  0x3a   : > { %1677 = vmatmul.mubr.msk.bf16.gmra.mrb[8].mxu1 %vm270_vm8, %v1890_v15 }
  0x3b   : > { %635 = vmatprep.mubr.bf16.mxu1 %v1992_v1 }
  0x42   : > { %1687 = vmatmul.mubr.msk.bf16.vlgmr.msra.gmra.mrb[12].mxu1 %vm270_vm8, %v1892_v16 }
  0x43   : > { %764 = vmatpush1.bf16.msra.mxu1 %v2087_v11  ;;  %645 = vmatprep.mubr.bf16.mxu1 %v1992_v1 }
  0x44   : > { %1083 = vmatprep.subr.bf16.mxu1 %v2085_v10 }
  0x4a   : > { %1688 = vmatmul.mubr.msk.bf16.gmra.mrb[16].mxu1 %vm270_vm8, %v1893_v17  ;;  %v348_v17 = vld [vmem:[%s2282_s2] sm:$0xff] }
  0x4b   : > { %795 = vmatprep.mubr.bf16.mxu1 %v1992_v1 }
  0x52   : > { %1697 = vmatmul.mubr.msk.bf16.vlgmr.msra.gmra.mrb[20].mxu1 %vm270_vm8, %v1894_v18 }
  0x53   : > { %805 = vmatprep.mubr.bf16.mxu1 %v1992_v1  ;;  %1084 = vmatpush1.bf16.msra.mxu1 %v2087_v11 }
  0x54   : > { %1243 = vmatprep.subr.bf16.mxu1 %v2085_v10 }
  0x5a   : > { %1698 = vmatmul.mubr.msk.bf16.gmra.mrb[24].mxu1 %vm270_vm8, %v1895_v19 }
  0x5b   : > { %1115 = vmatprep.mubr.bf16.mxu1 %v1992_v1 }
  0x62   : > { %1717 = vmatmul.mubr.msk.bf16.vlgmr.msra.gmra.mrb[28].mxu1 %vm270_vm8, %v1896_v21 }
  0x63   : > { %1125 = vmatprep.mubr.bf16.mxu1 %v1992_v1  ;;  %1244 = vmatpush1.bf16.msra.mxu1 %v2087_v11 }
  0x6a   : > { %1718 = vmatmul.mubr.msk.bf16.gmra.mrb[32].mxu1 %vm270_vm8, %v1898_v22 }
  0x6b   : > { %1275 = vmatprep.mubr.bf16.mxu1 %v1992_v1 }
  0x72   : > { %1727 = vmatmul.mubr.msk.bf16.vlgmr.msra.gmra.mrb[36].mxu1 %vm270_vm8, %v1900_v23 }
  0x73   : > { %1285 = vmatprep.mubr.bf16.mxu1 %v1992_v1 }
  0x7a   : > { %1728 = vmatmul.mubr.msk.bf16.gmra.mrb[40].mxu1 %vm270_vm8, %v1901_v24 }
  0xfd   : > { %v331_v25 = vpop.f32.mrb[0].mxu1  ;;  %v321_v26 = vpop.f32.mrb[0].mxu0 }
  0xfe   : > { %v333_v27 = vpop.f32.mrb[1].mxu1  ;;  %v340_v28 = vmax.f32 %v321_v26, 0.0  ;;  %v323_v29 = vpop.f32.mrb[1].mxu0  ;;  %v344_v33 = vmax.f32 %v331_v25, 0.0 }
  0xff   : > { %v335_v30 = vpop.f32.mrb[2].mxu1  ;;  %v341_v31 = vmax.f32 %v323_v29, 0.0  ;;  %v325_v32 = vpop.f32.mrb[2].mxu0  ;;  %v345_v38 = vmax.f32 %v333_v27, 0.0  ;;  %v1689_v29 = vld [vmem:[%s2282_s2 + $0x10] sm:$0xff] }
 0x100   : > { %v346_v34 = vmax.f32 %v335_v30, 0.0  ;;  %v337_v35 = vpop.f32.mrb[3].mxu1  ;;  %v342_v36 = vmax.f32 %v325_v32, 0.0  ;;  %v327_v37 = vpop.f32.mrb[3].mxu0 }
 0x101   : > { %v347_v39 = vmax.f32 %v337_v35, 0.0  ;;  %v343_v40 = vmax.f32 %v327_v37, 0.0 }
 0x102   : > { %v1761_v41 = vpack.c.bf16 %v346_v34, %v344_v33  ;;  %v1757_v42 = vpack.c.bf16 %v342_v36, %v340_v28 }
 0x103   : > { %v1759_v43 = vpack.c.bf16 %v347_v39, %v345_v38  ;;  %v1755_v44 = vpack.c.bf16 %v343_v40, %v341_v31 }
 0x105   : > { %v404_v45 = vpop.f32.mrb[4].mxu1 }
 0x106   : > { %v406_v46 = vpop.f32.mrb[5].mxu1  ;;  %v423_v48 = vmax.f32 %v404_v45, 0.0 }
 0x107   : > { %v408_v47 = vpop.f32.mrb[6].mxu1  ;;  %v424_v51 = vmax.f32 %v406_v46, 0.0 }
 0x108   : > { %v425_v49 = vmax.f32 %v408_v47, 0.0  ;;  %v410_v50 = vpop.f32.mrb[7].mxu1 }
 0x109   : > { %v426_v52 = vmax.f32 %v410_v50, 0.0  ;;  %v1899_v50 = vld [vmem:[%s2281_s1 + $0x48] sm:$0xff]  }
 0x10a   : > { %v1749_v53 = vpack.c.bf16 %v425_v49, %v423_v48  ;;  %v1699_v48 = vld [vmem:[%s2282_s2 + $0x18] sm:$0xff]  ;;  %v1897_v49 = vld [vmem:[%s2281_s1 + $0x40] sm:$0xff]  }
 0x10b   : > { %v1747_v54 = vpack.c.bf16 %v426_v52, %v424_v51 }
 0x10d   : > { %v414_v55 = vpop.f32.mrb[8].mxu1  ;;  %1748 = vmatprep.subr.bf16.mxu0 %v1747_v54 }
 0x10e   : > { %v416_v56 = vpop.f32.mrb[9].mxu1  ;;  %1750 = vmatpush1.bf16.msra.mxu0 %v1749_v53  ;;  %v427_v58 = vmax.f32 %v414_v55, 0.0 }
 0x10f   : > { %v418_v57 = vpop.f32.mrb[10].mxu1  ;;  %v428_v61 = vmax.f32 %v416_v56, 0.0 }
 0x110   : > { %v429_v59 = vmax.f32 %v418_v57, 0.0  ;;  %v420_v60 = vpop.f32.mrb[11].mxu1 }
 0x111   : > { %v430_v62 = vmax.f32 %v420_v60, 0.0 }
 0x112   : > { %v1753_v63 = vpack.c.bf16 %v429_v59, %v427_v58 }
 0x113   : > { %v1751_v0 = vpack.c.bf16 %v430_v62, %v428_v61 }
 0x115   : > { %1752 = vmatprep.subr.bf16.mxu0 %v1751_v0  ;;  %v637_v2 = vpop.f32.mrb[12].mxu1 }
 0x116   : > { %1754 = vmatpush1.bf16.msra.mxu0 %v1753_v63  ;;  %v639_v3 = vpop.f32.mrb[13].mxu1  ;;  %v656_v6 = vmax.f32 %v637_v2, 0.0 }
 0x117   : > { %v641_v5 = vpop.f32.mrb[14].mxu1  ;;  %1756 = vmatprep.subr.bf16.mxu0 %v1755_v44  ;;  %v657_v9 = vmax.f32 %v639_v3, 0.0 }
 0x118   : > { %v658_v7 = vmax.f32 %v641_v5, 0.0  ;;  %v643_v8 = vpop.f32.mrb[15].mxu1 }
 0x119   : > { %v659_v12 = vmax.f32 %v643_v8, 0.0  ;;  %1679 = vmatmul.mubr.msk.f32.vlgmr.msra.gmra.mrb[4].mxu0 %vm433_vm9, %v1678_v4 }
 0x11a   : > { %v1765_v13 = vpack.c.bf16 %v658_v7, %v656_v6  ;;  %1758 = vmatpush1.bf16.msra.mxu0 %v1757_v42  ;;  %575 = vmatprep.mubr.f32.mxu0 %v1994_v20 }
 0x11b   : > { %v1763_v14 = vpack.c.bf16 %v659_v12, %v657_v9  ;;  %1760 = vmatprep.subr.bf16.mxu0 %v1759_v43 }
 0x11d   : > { %v647_v15 = vpop.f32.mrb[16].mxu1 }
 0x11e   : > { %1762 = vmatpush1.bf16.msra.mxu0 %v1761_v41  ;;  %v649_v16 = vpop.f32.mrb[17].mxu1  ;;  %v660_v19 = vmax.f32 %v647_v15, 0.0 }
 0x11f   : > { %v651_v18 = vpop.f32.mrb[18].mxu1  ;;  %1764 = vmatprep.subr.bf16.mxu0 %v1763_v14  ;;  %v661_v23 = vmax.f32 %v649_v16, 0.0 }
 0x120   : > { %v662_v21 = vmax.f32 %v651_v18, 0.0  ;;  %v653_v22 = vpop.f32.mrb[19].mxu1 }
 0x121   : > { %v663_v24 = vmax.f32 %v653_v22, 0.0  ;;  %1680 = vmatmul.mubr.msk.f32.vlgmr.msra.gmra.mrb[4].mxu0 %vm433_vm9, %v348_v17 }
 0x122   : > { %v1769_v25 = vpack.c.bf16 %v662_v21, %v660_v19  ;;  %1766 = vmatpush1.bf16.msra.mxu0 %v1765_v13  ;;  %733 = vmatprep.mubr.f32.mxu0 %v1994_v20 }
 0x123   : > { %v1767_v26 = vpack.c.bf16 %v663_v24, %v661_v23 }
 0x125   : > { %1768 = vmatprep.subr.bf16.mxu0 %v1767_v26  ;;  %v797_v27 = vpop.f32.mrb[20].mxu1 }
 0x126   : > { %1770 = vmatpush1.bf16.msra.mxu0 %v1769_v25  ;;  %v799_v28 = vpop.f32.mrb[21].mxu1  ;;  %v816_v31 = vmax.f32 %v797_v27, 0.0 }
 0x127   : > { %v801_v30 = vpop.f32.mrb[22].mxu1  ;;  %v817_v34 = vmax.f32 %v799_v28, 0.0 }
 0x128   : > { %v818_v32 = vmax.f32 %v801_v30, 0.0  ;;  %v803_v33 = vpop.f32.mrb[23].mxu1 }
 0x129   : > { %v819_v35 = vmax.f32 %v803_v33, 0.0  ;;  %1690 = vmatmul.mubr.msk.f32.vlgmr.msra.gmra.mrb[4].mxu0 %vm433_vm9, %v1689_v29 }
 0x12a   : > { %v1773_v36 = vpack.c.bf16 %v818_v32, %v816_v31  ;;  %893 = vmatprep.mubr.f32.mxu0 %v1994_v20 }
 0x12b   : > { %v1771_v37 = vpack.c.bf16 %v819_v35, %v817_v34 }
 0x12d   : > { %v807_v38 = vpop.f32.mrb[24].mxu1  ;;  %1772 = vmatprep.subr.bf16.mxu0 %v1771_v37 }
 0x12e   : > { %v809_v39 = vpop.f32.mrb[25].mxu1  ;;  %1774 = vmatpush1.bf16.msra.mxu0 %v1773_v36  ;;  %v820_v41 = vmax.f32 %v807_v38, 0.0 }
 0x12f   : > { %v811_v40 = vpop.f32.mrb[26].mxu1  ;;  %v821_v44 = vmax.f32 %v809_v39, 0.0 }
 0x130   : > { %v822_v42 = vmax.f32 %v811_v40, 0.0  ;;  %v813_v43 = vpop.f32.mrb[27].mxu1 }
 0x131   : > { %v823_v45 = vmax.f32 %v813_v43, 0.0 }
 0x132   : > { %v1777_v46 = vpack.c.bf16 %v822_v42, %v820_v41 }
 0x133   : > { %v1775_v47 = vpack.c.bf16 %v823_v45, %v821_v44 }
 0x135   : > { %1776 = vmatprep.subr.bf16.mxu0 %v1775_v47  ;;  %v1117_v51 = vpop.f32.mrb[28].mxu1 }
 0x136   : > { %1778 = vmatpush1.bf16.msra.mxu0 %v1777_v46  ;;  %v1136_v52 = vmax.f32 %v1117_v51, 0.0  ;;  %v1119_v53 = vpop.f32.mrb[29].mxu1  ;;  %v1709_v51 = vld [vmem:[%s2282_s2 + $0x20] sm:$0xff] }
 0x137   : > { %923 = vmatprep.subr.bf16.mxu0 %v2085_v10  ;;  %v1137_v54 = vmax.f32 %v1119_v53, 0.0  ;;  %v1121_v55 = vpop.f32.mrb[30].mxu1  ;;  %v1729_v53 = vld [vmem:[%s2282_s2 + $0x30] sm:$0xff] }
 0x138   : > { %v1138_v56 = vmax.f32 %v1121_v55, 0.0  ;;  %v1123_v57 = vpop.f32.mrb[31].mxu1  ;;  %v1903_v55 = vld [vmem:[%s2281_s1 + $0x78] sm:$0xff]  }
 0x139   : > { %1700 = vmatmul.mubr.msk.f32.vlgmr.msra.gmra.mrb[4].mxu0 %vm433_vm9, %v1699_v48  ;;  %v1139_v58 = vmax.f32 %v1123_v57, 0.0 }
 0x13a   : > { %924 = vmatpush1.bf16.msra.mxu0 %v2087_v11  ;;  %955 = vmatprep.mubr.bf16.mxu0 %v1992_v1  ;;  %v1789_v59 = vpack.c.bf16 %v1138_v56, %v1136_v52  ;;  %v1719_v52 = vld [vmem:[%s2282_s2 + $0x28] sm:$0xff] }
 0x13b   : > { %v1787_v60 = vpack.c.bf16 %v1139_v58, %v1137_v54  ;;  %v1902_v54 = vld [vmem:[%s2281_s1 + $0x70] sm:$0xff]  }
 0x13d   : > { %1707 = vmatmul.mubr.msk.bf16.vlgmr.msra.gmra.mrb[8].mxu0 %vm270_vm8, %v1897_v49  ;;  %v1127_v61 = vpop.f32.mrb[32].mxu1 }
 0x13e   : > { %965 = vmatprep.mubr.bf16.mxu0 %v1992_v1  ;;  %v1140_v62 = vmax.f32 %v1127_v61, 0.0  ;;  %v1129_v63 = vpop.f32.mrb[33].mxu1 }
 0x13f   : > { %v1141_v0 = vmax.f32 %v1129_v63, 0.0  ;;  %v1131_v2 = vpop.f32.mrb[34].mxu1 }
 0x140   : > { %v1142_v3 = vmax.f32 %v1131_v2, 0.0  ;;  %v1133_v4 = vpop.f32.mrb[35].mxu1 }
 0x141   : > { %v1143_v5 = vmax.f32 %v1133_v4, 0.0 }
 0x142   : > { %v1793_v6 = vpack.c.bf16 %v1142_v3, %v1140_v62 }
 0x143   : > { %v1791_v7 = vpack.c.bf16 %v1143_v5, %v1141_v0 }
 0x145   : > { %1708 = vmatmul.mubr.msk.bf16.gmra.mrb[12].mxu0 %vm270_vm8, %v1899_v50  ;;  %v1277_v8 = vpop.f32.mrb[36].mxu1 }
 0x146   : > { %1053 = vmatprep.mubr.f32.mxu0 %v1994_v20  ;;  %v1296_v9 = vmax.f32 %v1277_v8, 0.0  ;;  %v1279_v12 = vpop.f32.mrb[37].mxu1 }
 0x147   : > { %v1297_v13 = vmax.f32 %v1279_v12, 0.0  ;;  %v1281_v14 = vpop.f32.mrb[38].mxu1  ;;  %v1739_v12 = vld [vmem:[%s2282_s2 + $0x38] sm:$0xff] }
 0x148   : > { %v1298_v15 = vmax.f32 %v1281_v14, 0.0  ;;  %v1283_v16 = vpop.f32.mrb[39].mxu1 }
 0x149   : > { %v1299_v17 = vmax.f32 %v1283_v16, 0.0 }
 0x14a   : > { %v1797_v18 = vpack.c.bf16 %v1298_v15, %v1296_v9 }
 0x14b   : > { %v1795_v19 = vpack.c.bf16 %v1299_v17, %v1297_v13 }
 0x14d   : > { %v1287_v21 = vpop.f32.mrb[40].mxu1 }
 0x14e   : > { %v1300_v22 = vmax.f32 %v1287_v21, 0.0  ;;  %v1289_v23 = vpop.f32.mrb[41].mxu1 }
 0x14f   : > { %v1301_v24 = vmax.f32 %v1289_v23, 0.0  ;;  %v1291_v25 = vpop.f32.mrb[42].mxu1 }
 0x150   : > { %v1302_v26 = vmax.f32 %v1291_v25, 0.0  ;;  %v1293_v27 = vpop.f32.mrb[43].mxu1 }
 0x151   : > { %v1303_v28 = vmax.f32 %v1293_v27, 0.0 }
 0x152   : > { %v1801_v29 = vpack.c.bf16 %v1302_v26, %v1300_v22 }
 0x153   : > { %v1799_v30 = vpack.c.bf16 %v1303_v28, %v1301_v24 }
 0x210   : > { %v957_v31 = vpop.f32.mrb[8].mxu0 }
 0x211   : > { %v959_v32 = vpop.f32.mrb[9].mxu0  ;;  %v976_v34 = vmax.f32 %v957_v31, 0.0 }
 0x212   : > { %v961_v33 = vpop.f32.mrb[10].mxu0  ;;  %v977_v37 = vmax.f32 %v959_v32, 0.0 }
 0x213   : > { %v978_v35 = vmax.f32 %v961_v33, 0.0  ;;  %v963_v36 = vpop.f32.mrb[11].mxu0 }
 0x214   : > { %v979_v38 = vmax.f32 %v963_v36, 0.0 }
 0x215   : > { %v1781_v39 = vpack.c.bf16 %v978_v35, %v976_v34 }
 0x216   : > { %v1779_v40 = vpack.c.bf16 %v979_v38, %v977_v37 }
 0x218   : > { %v967_v41 = vpop.f32.mrb[12].mxu0  ;;  %1780 = vmatprep.subr.bf16.mxu0 %v1779_v40 }
 0x219   : > { %v969_v42 = vpop.f32.mrb[13].mxu0  ;;  %1782 = vmatpush1.bf16.msra.mxu0 %v1781_v39  ;;  %v980_v44 = vmax.f32 %v967_v41, 0.0 }
 0x21a   : > { %v971_v43 = vpop.f32.mrb[14].mxu0  ;;  %v981_v47 = vmax.f32 %v969_v42, 0.0 }
 0x21b   : > { %v982_v45 = vmax.f32 %v971_v43, 0.0  ;;  %v973_v46 = vpop.f32.mrb[15].mxu0 }
 0x21c   : > { %v983_v48 = vmax.f32 %v973_v46, 0.0 }
 0x21d   : > { %v1785_v49 = vpack.c.bf16 %v982_v45, %v980_v44 }
 0x21e   : > { %v1783_v50 = vpack.c.bf16 %v983_v48, %v981_v47 }
 0x220   : > { %1784 = vmatprep.subr.bf16.mxu0 %v1783_v50 }
 0x221   : > { %1786 = vmatpush1.bf16.msra.mxu0 %v1785_v49 }
 0x222   : > { %1788 = vmatprep.subr.bf16.mxu0 %v1787_v60 }
 0x224   : > { %1710 = vmatmul.mubr.msk.f32.vlgmr.msra.gmra.mrb[4].mxu0 %vm433_vm9, %v1709_v51 }
 0x225   : > { %1790 = vmatpush1.bf16.msra.mxu0 %v1789_v59  ;;  %1213 = vmatprep.mubr.f32.mxu0 %v1994_v20 }
 0x226   : > { %1792 = vmatprep.subr.bf16.mxu0 %v1791_v7 }
 0x229   : > { %1794 = vmatpush1.bf16.msra.mxu0 %v1793_v6 }
 0x22a   : > { %1796 = vmatprep.subr.bf16.mxu0 %v1795_v19 }
 0x22c   : > { %1720 = vmatmul.mubr.msk.f32.vlgmr.msra.gmra.mrb[4].mxu0 %vm433_vm9, %v1719_v52 }
 0x22d   : > { %1798 = vmatpush1.bf16.msra.mxu0 %v1797_v18  ;;  %1373 = vmatprep.mubr.f32.mxu0 %v1994_v20 }
 0x22e   : > { %1800 = vmatprep.subr.bf16.mxu0 %v1799_v30 }
 0x231   : > { %1802 = vmatpush1.bf16.msra.mxu0 %v1801_v29 }
 0x232   : > { %1403 = vmatprep.subr.bf16.mxu0 %v2085_v10  ;;  %v1542_v10 = vld [vmem:[%s2283_s3] sm:$0xff] }
 0x233   : > { %1545 = vperm.xlu0 %1885, %v1542_v10  }
 0x234   : > { %1730 = vmatmul.mubr.msk.f32.vlgmr.msra.gmra.mrb[4].mxu0 %vm433_vm9, %v1729_v53 }
 0x235   : > { %1404 = vmatpush1.bf16.msra.mxu0 %v2087_v11  ;;  %1435 = vmatprep.mubr.bf16.mxu0 %v1992_v1 }
 0x238   : > { %1737 = vmatmul.mubr.msk.bf16.vlgmr.msra.gmra.mrb[16].mxu0 %vm270_vm8, %v1902_v54 }
 0x239   : > { %1445 = vmatprep.mubr.bf16.mxu0 %v1992_v1 }
 0x240   : > { %1738 = vmatmul.mubr.msk.bf16.gmra.mrb[20].mxu0 %vm270_vm8, %v1903_v55 }
 0x241   : > { %1533 = vmatprep.mubr.f32.mxu0 %v1994_v20 }
 0x2b2   : > { %v1546_v13 = vpop.permute.xlu0 %1545 }
 0x30b   : > { %v1437_v11 = vpop.f32.mrb[16].mxu0 }
 0x30c   : > { %v1439_v56 = vpop.f32.mrb[17].mxu0  ;;  %v1456_v58 = vmax.f32 %v1437_v11, 0.0 }
 0x30d   : > { %v1441_v57 = vpop.f32.mrb[18].mxu0  ;;  %v1457_v1 = vmax.f32 %v1439_v56, 0.0 }
 0x30e   : > { %v1458_v59 = vmax.f32 %v1441_v57, 0.0  ;;  %v1443_v60 = vpop.f32.mrb[19].mxu0 }
 0x30f   : > { %v1459_v61 = vmax.f32 %v1443_v60, 0.0 }
 0x310   : > { %v1805_v62 = vpack.c.bf16 %v1458_v59, %v1456_v58 }
 0x311   : > { %v1803_v63 = vpack.c.bf16 %v1459_v61, %v1457_v1 }
 0x313   : > { %v1447_v0 = vpop.f32.mrb[20].mxu0  ;;  %1804 = vmatprep.subr.bf16.mxu0 %v1803_v63 }
 0x314   : > { %v1449_v2 = vpop.f32.mrb[21].mxu0  ;;  %1806 = vmatpush1.bf16.msra.mxu0 %v1805_v62  ;;  %v1460_v3 = vmax.f32 %v1447_v0, 0.0 }
 0x315   : > { %v1451_v20 = vpop.f32.mrb[22].mxu0  ;;  %v1461_v6 = vmax.f32 %v1449_v2, 0.0 }
 0x316   : > { %v1462_v4 = vmax.f32 %v1451_v20, 0.0  ;;  %v1453_v5 = vpop.f32.mrb[23].mxu0 }
 0x317   : > { %v1463_v7 = vmax.f32 %v1453_v5, 0.0 }
 0x318   : > { %v1809_v8 = vpack.c.bf16 %v1462_v4, %v1460_v3 }
 0x319   : > { %v1807_v9 = vpack.c.bf16 %v1463_v7, %v1461_v6 }
 0x31b   : > { %1808 = vmatprep.subr.bf16.mxu0 %v1807_v9 }
 0x31c   : > { %1810 = vmatpush1.bf16.msra.mxu0 %v1809_v8 }
 0x31f   : > { %1740 = vmatmul.mubr.msk.f32.vlgmr.msra.gmra.mrb[4].mxu0 %vm433_vm9, %v1739_v12 }
 0x3f2   : > { %v1535_v14 = vpop.f32.mrb[4].mxu0 }
 0x3f3   : > { %v1548_v15 = vadd.f32 %v1546_v13, %v1535_v14  ;;  %v1537_v16 = vpop.f32.mrb[5].mxu0 }
 0x3f4   : > { %v1549_v17 = vadd.f32 %v1546_v13, %v1537_v16 }
 0x3f5   : > { %v1550_v18 = vsub.f32 0.0, %v1548_v15 }
 0x3f6   : > { %v1551_v19 = vsub.f32 0.0, %v1549_v17 }
 0x3f7   : > { %v1552_v21 = vmul.f32 1.442695, %v1550_v18 }
 0x3f8   : > { %v1554_v22 = vmul.f32 1.442695, %v1551_v19 }
 0x3f9   : > { %1904 = vpow2.f32 %v1552_v21 }
 0x3fa   : > { %1906 = vpow2.f32 %v1554_v22 }
 0x403   : > { %v1905_v23 = vpop.eup %1904 }
 0x404   : > { %v1907_v24 = vpop.eup %1906  ;;  %v1556_v25 = vadd.f32 1.0, %v1905_v23 }
 0x405   : > { %v1557_v26 = vadd.f32 1.0, %v1907_v24 }
 0x406   : > { %1908 = vrcp.f32 %v1556_v25 }
 0x407   : > { %1910 = vrcp.f32 %v1557_v26 }
 0x410   : > { %v1909_v27 = vpop.eup %1908 }
 0x411   : > { %v1911_v28 = vpop.eup %1910  ;;  %1560 = vst [vmem:[%s215_s13] sm:$0xff] %v1909_v27 }
 0x412   : > { %1561 = vst [vmem:[%s215_s13 + $0x8] sm:$0xff] %v1911_v28 }
 0x413   : > { %1925 = shalt.err (!%p1922_p5)
}
 0x414   : > { %s1926_s6 = scalar_lea.hbm %s2233_s24, 256  ;;  %s1930_s9 = scalar_lea.hbm %s2284_s4, 512 }
 0x415   : > { %p1927_p6 = scmp.ne.s32.totalorder %s2233_s24, %s1926_s6  ;;  %p1931_p10 = scmp.lt.u32.totalorder %s2233_s24, %s2284_s4 }
 0x416   : > { %p1932_p11 = scmp.lt.u32.totalorder %s1930_s9, %s1926_s6  ;;  %p1934_p13 = scmp.lt.u32.totalorder %s1926_s6, %s2233_s24 }
 0x417   : > { %p1928_p7 = pnand %p1927_p6, %p2061_p4 }
 0x418   : > { %p1933_p12 = por %p1932_p11, %p1931_p10 }
 0x419   : > { %p1929_p9 = pneg %p1928_p7 }
 0x41a   : > { %p1935_p0 = por %p1934_p13, %p1933_p12 }
 0x41c   : > { %p1936_p1 = pnand %p1935_p0, %p1929_p9 }
 0x41e   : > { %1939 = shalt.err (!%p1936_p1)
}
 0x41f   : > { %1827 = dma.vmem_to_hbm [thread:$0]  (%p2061_p4), %s2235_s14, 256, %s2233_s24, %s1563_s26  }
 0x420 PF: > { %p1833_p2 = scmp.ge.s32.totalorder %s1990_s20, 2  ;;  %s1591_s12 = sand.u32 1, %s1970_s15  }
 0x421   : > { %s1592_s13 = scalar_lea.sflag [#allocation4], %s1591_s12 }
 0x422   : > { %p1830_p3 = pnand %p1833_p2, %p2068_p8 }
 0x424   : > { %1965 = dma.done.wait (!%p1830_p3), %s1592_s13, 256  }
 0x425   : > { %1967 = vsyncadd (!%p1830_p3), %s1592_s13, 4294967040  ;;  %s17_s20 = sadd.s32 1, %s1990_s20   ;;  %s2287_s15 = smov %s1974_s16 }
 0x426   : > { %p14_p5 = scmp.ge.s32.totalorder %s17_s20, 4   ;;  %s2288_s16 = smov %s1978_s17 }
 0x427   : > { %s2289_s17 = smov %s2074_s28  ;;  %s2290_s18 = smov %s1986_s19 }
 0x428   : > { %s2291_s19 = smov %s2293_s23  ;;  %16 = sbr.rel (!%p14_p5) target bundleno = 4 (0x4), region = 85 }
 0x42f   :  { %1597 = vsyncpa [#allocation4], 1 }
 0x430   :  { %1599 = vsyncpa [#allocation4 + $0x1], 1 }

</bundles_post_ra>
